<compile_context>
chip_gen: v5e
topology: v5e:2x2
jax: 0.10.0
libtpu: 0.0.40
codegen_flags: <defaults>
</compile_context>

<pallas_src>
import math

import jax
import jax.numpy as jnp
from jax.experimental import pallas as pl
from jax.experimental.pallas import tpu as pltpu


def _tile_channels_kernel(x_ref, o_ref):
    # x_ref: (ta, M)   o_ref: (ta, n*M)
    m = x_ref.shape[-1]
    n = o_ref.shape[-1] // m
    for c in range(n):
        # Static lane-offset slice -> dense, unmasked stores when M % 128 == 0.
        o_ref[:, c * m:(c + 1) * m] = x_ref[...]


def _plan_rows(A, M, n, dtype, budget=5 << 20, hard_cap=7 << 20):
    """Rows per grid step (ta), or None if no safe block exists.

    budget  : target bytes per step for (input block + output block); with the
              default double buffering the pipeline uses ~2x this, staying under
              the 16 MiB scoped-VMEM default of v5e (32 MiB v6e/v7x).
    hard_cap: absolute per-step ceiling before we refuse and fall back to XLA.
    """
    item = jnp.dtype(dtype).itemsize
    sub = max(8, 32 // item)                         # min sublane tile: 8 f32 / 16 bf16 / 32 int8
    pad = lambda v, q: -(-v // q) * q
    per_row = (pad(M, 128) + pad(n * M, 128)) * item  # in + out bytes per A-row
    ta_fit = max(1, budget // per_row)
    if ta_fit >= A:
        ta = A
    elif ta_fit >= sub:
        ta = (ta_fit // sub) * sub                   # sublane-aligned dense blocks
    else:
        ta = A if A < sub else sub                   # huge rows: smallest legal dense block
    if ta * per_row > hard_cap:
        return None                                  # would endanger scoped VMEM -> XLA fallback
    if ta == A and A >= 2 * sub:
        # Whole array would fit one block; split in two so v7x megacore can
        # shard the copy bandwidth across both TensorCores.
        ta = pad(-(-A // 2), sub)
    return ta


def tile_channels(x, dim=0, n_channels=3, *, force_pallas=False):
    """Pallas equivalent of TileChannels(dim, n_channels).forward(x)."""
    ndim = x.ndim
    dim = dim % ndim
    shape = x.shape

    out_shape = list(shape)
    out_shape[dim] = shape[dim] * n_channels
    out_shape = tuple(out_shape)

    if n_channels == 1:
        return x                                     # tile with all-ones dims == identity

    A = math.prod(shape[:dim])                       # rows before the tiled dim
    M = math.prod(shape[dim:])                       # everything from the tiled dim onward
    itemsize = jnp.dtype(x.dtype).itemsize
    out_bytes = A * n_channels * M * itemsize

    ta = _plan_rows(A, M, n_channels, x.dtype)

    if ta is None or (not force_pallas and out_bytes <= 512 * 1024):
        # Tiny inputs (the ROInet (1,16,16)->(3,16,16) default): pallas_call
        # launch + per-step overhead dominates a few-KiB copy, and under jit XLA
        # fuses this broadcast into the consumer.  Also guards rows too large to
        # tile within the scoped-VMEM limit.
        x3 = x.reshape(A, 1, M)
        return jnp.broadcast_to(x3, (A, n_channels, M)).reshape(out_shape)

    x2 = x.reshape(A, M)
    grid = (pl.cdiv(A, ta),)

    out2 = pl.pallas_call(
        _tile_channels_kernel,
        out_shape=jax.ShapeDtypeStruct((A, n_channels * M), x.dtype),
        grid=grid,
        in_specs=[pl.BlockSpec((ta, M), lambda i: (i, 0))],
        out_specs=pl.BlockSpec((ta, n_channels * M), lambda i: (i, 0)),
        compiler_params=pltpu.CompilerParams(
            dimension_semantics=("parallel",),       # row tiles are independent (v7x megacore)
        ),
        cost_estimate=pl.CostEstimate(
            flops=0,
            transcendentals=0,
            bytes_accessed=(1 + n_channels) * A * M * itemsize,
        ),
    )(x2)

    return out2.reshape(out_shape)


if __name__ == "__main__":
    key = jax.random.PRNGKey(0)
    k0, k1, k2, k3, k4 = jax.random.split(key, 5)

    # Case 1: ROInet default usage, TileChannels(dim=0, n_channels=3):
    # (1, 16, 16) -> (3, 16, 16).  Tiny -> broadcast fast path (no pallas_call).
    x0 = jax.random.normal(k0, (1, 16, 16), dtype=jnp.float32)
    y0 = jax.block_until_ready(tile_channels(x0, dim=0, n_channels=3))
    assert y0.shape == (3, 16, 16)
    assert jnp.array_equal(y0, jnp.tile(x0, (3, 1, 1)))

    # Case 2: batched NCHW channel tiling (dim=1): (2, 1, 16, 16) -> (2, 3, 16, 16).
    x1 = jax.random.normal(k1, (2, 1, 16, 16), dtype=jnp.float32)
    y1 = jax.block_until_ready(tile_channels(x1, dim=1, n_channels=3))
    assert y1.shape == (2, 3, 16, 16)
    assert jnp.array_equal(y1, jnp.tile(x1, (1, 3, 1, 1)))

    # Case 3: general torch.tile semantics (source extent > 1 along dim), forced
    # through the Pallas kernel: (2, 4, 16, 16) -> (2, 12, 16, 16).
    x2 = jax.random.normal(k2, (2, 4, 16, 16), dtype=jnp.float32)
    y2 = jax.block_until_ready(tile_channels(x2, dim=1, n_channels=3, force_pallas=True))
    assert y2.shape == (2, 12, 16, 16)
    assert jnp.array_equal(y2, jnp.tile(x2, (1, 3, 1, 1)))

    # Case 4: bf16, forced Pallas path (exercises dtype-aware sublane tiling):
    # (16, 1, 64, 128) -> (16, 3, 64, 128).
    x3 = jax.random.normal(k3, (16, 1, 64, 128), dtype=jnp.bfloat16)
    y3 = jax.block_until_ready(tile_channels(x3, dim=1, n_channels=3, force_pallas=True))
    assert y3.shape == (16, 3, 64, 128)
    assert jnp.array_equal(y3, jnp.tile(x3, (1, 3, 1, 1)))

    # Case 5: larger batched case that naturally takes the Pallas path:
    # (8, 1, 128, 256) -> (8, 3, 128, 256) (~3 MiB of output).
    x4 = jax.random.normal(k4, (8, 1, 128, 256), dtype=jnp.float32)
    y4 = jax.block_until_ready(tile_channels(x4, dim=1, n_channels=3))
    assert y4.shape == (8, 3, 128, 256)
    assert jnp.array_equal(y4, jnp.tile(x4, (1, 3, 1, 1)))

    print("KERNEL_OK")
</pallas_src>

<mosaic_0001>
module attributes {stable_mosaic.version = 11 : i64} {
  func.func @_tile_channels_kernel(%arg0: i32, %arg1: memref<2x1024xf32, #tpu.memory_space<vmem>>, %arg2: memref<2x3072xf32, #tpu.memory_space<vmem>>) attributes {dimension_semantics = [#tpu.dimension_semantics<parallel>], iteration_bounds = array<i64: 1>, scalar_prefetch = 0 : i64, scratch_operands = 0 : i64, tpu.core_type = #tpu.core_type<tc>, window_params = [{transform_indices = @transform_0, window_bounds = array<i64: 2, 1024>}, {transform_indices = @transform_1, window_bounds = array<i64: 2, 3072>}]} {
    %c0 = arith.constant 0 : index
    %c0_0 = arith.constant 0 : index
    %0 = vector.load %arg1[%c0, %c0_0] : memref<2x1024xf32, #tpu.memory_space<vmem>>, vector<2x1024xf32>
    %c0_1 = arith.constant 0 : index
    %c0_2 = arith.constant 0 : index
    %1 = vector.load %arg2[%c0_1, %c0_2] : memref<2x3072xf32, #tpu.memory_space<vmem>>, vector<2x1024xf32>
    tpu.vector_store %arg2[%c0_1, %c0_2], %0 {strides = array<i32>} : memref<2x3072xf32, #tpu.memory_space<vmem>>, vector<2x1024xf32>,
    %c0_3 = arith.constant 0 : index
    %c0_4 = arith.constant 0 : index
    %2 = vector.load %arg1[%c0_3, %c0_4] : memref<2x1024xf32, #tpu.memory_space<vmem>>, vector<2x1024xf32>
    %c0_5 = arith.constant 0 : index
    %c1024 = arith.constant 1024 : index
    %3 = vector.load %arg2[%c0_5, %c1024] : memref<2x3072xf32, #tpu.memory_space<vmem>>, vector<2x1024xf32>
    tpu.vector_store %arg2[%c0_5, %c1024], %2 {strides = array<i32>} : memref<2x3072xf32, #tpu.memory_space<vmem>>, vector<2x1024xf32>,
    %c0_6 = arith.constant 0 : index
    %c0_7 = arith.constant 0 : index
    %4 = vector.load %arg1[%c0_6, %c0_7] : memref<2x1024xf32, #tpu.memory_space<vmem>>, vector<2x1024xf32>
    %c0_8 = arith.constant 0 : index
    %c2048 = arith.constant 2048 : index
    %5 = vector.load %arg2[%c0_8, %c2048] : memref<2x3072xf32, #tpu.memory_space<vmem>>, vector<2x1024xf32>
    tpu.vector_store %arg2[%c0_8, %c2048], %4 {strides = array<i32>} : memref<2x3072xf32, #tpu.memory_space<vmem>>, vector<2x1024xf32>,
    return
  }
  func.func @transform_0(%arg0: i32) -> (i32, i32) {
    %c0_i32 = arith.constant 0 : i32
    %c0_i32_0 = arith.constant 0 : i32
    return %arg0, %c0_i32 : i32, i32
  }
  func.func @transform_1(%arg0: i32) -> (i32, i32) {
    %c0_i32 = arith.constant 0 : i32
    %c0_i32_0 = arith.constant 0 : i32
    return %arg0, %c0_i32 : i32, i32
  }
}

</mosaic_0001>

<bundles_post_ra>
// kernel: tpu_custom_call.1
= control target key start
LH: loop header
LB: loop body
LE: loop exit
PB: predicated region body
PF: predicated region fallthrough
CT: control target
= control target key end

     0   :  { %6 = vsyncpa [#allocation3], 0  ;;  %s124_s0 = inlined_call_operand.hbm [shape: f32[2,1024], index: 0, kind: input, shape index: {}]   ;;  %s125_s1 = inlined_call_operand.hbm [shape: f32[2,3072], index: 1, kind: output, shape index: {}]  }
   0x1   :  { %7 = vsyncpa [#allocation4], 0  ;;  %s13_s8 = sshll.u32 %s124_s0, 4  ;;  %s106_s9 = smov [#allocation2]   ;;  %s14_s8 = int_to_ptr.hbm [resolvable:$true] %s13_s8 }
   0x2   :  { %s15_s10 = sshll.u32 %s106_s9, 4  ;;  %s16_s10 = int_to_ptr.vmem [resolvable:$true] %s15_s10 }
   0x3   :  { %18 = dma.hbm_to_vmem [thread:$0]  %s14_s8, 256, %s16_s10, [#allocation3]  }
   0x4   :  { %102 = dma.done.wait [#allocation3], 256  }
   0x5   :  { %103 = vsyncadd [#allocation3], 4294967040  ;;  %v23_v0 = vld [vmem:[#allocation2] sm:$0xff]  ;;  %v24_v1 = vld [vmem:[#allocation2 + $0x8] sm:$0xff]  ;;  %s107_s11 = smov [#allocation5]   ;;  %s42_s15 = sshll.u32 %s125_s1, 4  ;;  %s43_s15 = int_to_ptr.hbm [resolvable:$true] %s42_s15 }
   0x6   :  { %25 = vst [vmem:[#allocation5] sm:$0xff] %v23_v0  ;;  %s40_s12 = sshll.u32 %s107_s11, 4  ;;  %s41_s12 = int_to_ptr.vmem [resolvable:$true] %s40_s12 }
   0x7   :  { %26 = vst [vmem:[#allocation5 + $0x8] sm:$0xff] %v24_v1 }
   0x8   :  { %29 = vst [vmem:[#allocation5 + $0x10] sm:$0xff] %v23_v0 }
   0x9   :  { %30 = vst [vmem:[#allocation5 + $0x18] sm:$0xff] %v24_v1 }
   0xa   :  { %33 = vst [vmem:[#allocation5 + $0x20] sm:$0xff] %v23_v0 }
   0xb   :  { %34 = vst [vmem:[#allocation5 + $0x28] sm:$0xff] %v24_v1 }
   0xc   :  { %45 = dma.vmem_to_hbm [thread:$0]  %s41_s12, 768, %s43_s15, [#allocation4]  }
   0xd   :  { %104 = dma.done.wait [#allocation4], 768  }
   0xe   :  { %105 = vsyncadd [#allocation4], 4294966528 }
   0xf   :  { %50 = vsyncpa [#allocation3], 1 }
  0x10   :  { %51 = vsyncpa [#allocation4], 1 }

</bundles_post_ra>
